<compile_context>
chip_gen: v6e
topology: v6e:2x2x1
jax: 0.10.0
libtpu: 0.0.40
codegen_flags: <defaults>
</compile_context>

<pallas_src>
import functools

import jax
import jax.numpy as jnp
from jax import lax
from jax.experimental import pallas as pl
from jax.experimental.pallas import tpu as pltpu


# ----------------------------------------------------------------------------
# config knobs
# ----------------------------------------------------------------------------
_VMEM_LIMIT = 40 * 1024 * 1024        # valid on v5e/v6e (128 MiB phys) and v7x (64 MiB)
_FUSED_MAX_N = 1024                   # A_hat bf16 <= 2 MiB -> all-layer fused kernel
_FUSED_MAX_F = 2048                   # keep the fused path's X buffer small
_XW_RESIDENT_MAX_BYTES = 8 * 1024 * 1024   # double-buffered XW residency budget


def _round_up(x, m):
    return (x + m - 1) // m * m


def _pad2(x, rows, cols):
    return jnp.pad(x, ((0, rows - x.shape[0]), (0, cols - x.shape[1])))


def _pick_tiles(num_nodes):
    """Large-graph tiling: (n_pad, tm, tk) with tm, tk dividing n_pad."""
    n_pad = _round_up(num_nodes, 512)
    tm = 1024 if n_pad % 1024 == 0 else 512
    if n_pad % 2048 == 0:
        tk = 2048
    elif n_pad % 1024 == 0:
        tk = 1024
    else:
        tk = 512
    return n_pad, tm, tk


# ----------------------------------------------------------------------------
# Glue: dense symmetric-normalized adjacency (GCN norm, self loops), bf16, padded
# ----------------------------------------------------------------------------
def build_norm_adj_bf16(edge_index, edge_weight, num_nodes, n_pad):
    src = edge_index[0]
    dst = edge_index[1]
    if edge_weight is None:
        edge_weight = jnp.ones(src.shape, dtype=jnp.float32)
    loop = jnp.arange(num_nodes, dtype=src.dtype)
    src = jnp.concatenate([src, loop])
    dst = jnp.concatenate([dst, loop])
    w = jnp.concatenate(
        [edge_weight.astype(jnp.float32), jnp.ones((num_nodes,), jnp.float32)])
    # scatter straight into the padded buffer; A[dst, src] (message flows src -> dst)
    a = jnp.zeros((n_pad, n_pad), dtype=jnp.float32).at[dst, src].add(w)
    deg = a.sum(axis=1)
    deg_safe = jnp.where(deg > 0.0, deg, 1.0)
    d = jnp.where(deg > 0.0, lax.rsqrt(deg_safe), 0.0)
    # D^{-1/2} A D^{-1/2}, scale + bf16 cast fused in one expression
    return (d[:, None] * a * d[None, :]).astype(jnp.bfloat16)


# ----------------------------------------------------------------------------
# Small-graph fast path: one pallas_call, everything VMEM-resident, all layers fused
# ----------------------------------------------------------------------------
def fused_encoder_call(a_pad, x_pad, ws, biases, alpha, *, nm_layers, n_pad,
                       f_pad, z_pad):
    def kernel(*refs):
        a_ref, x_ref = refs[0], refs[1]
        w_refs = refs[2:2 + nm_layers]
        b_refs = refs[2 + nm_layers:2 + 2 * nm_layers]
        alpha_ref = refs[2 + 2 * nm_layers]
        o_ref = refs[-1]

        a = a_ref[...]
        alpha_v = alpha_ref[...]
        xw = jnp.dot(x_ref[...], w_refs[0][...],
                     preferred_element_type=jnp.float32).astype(jnp.bfloat16)
        h = None
        for i in range(nm_layers):
            agg = jnp.dot(a, xw, preferred_element_type=jnp.float32) + b_refs[i][...]
            h = jnp.where(agg > 0.0, agg, alpha_v * agg)
            if i < nm_layers - 1:
                xw = jnp.dot(h.astype(jnp.bfloat16), w_refs[i + 1][...],
                             preferred_element_type=jnp.float32).astype(jnp.bfloat16)
        o_ref[...] = h

    in_specs = [
        pl.BlockSpec((n_pad, n_pad), lambda i: (0, 0)),
        pl.BlockSpec((n_pad, f_pad), lambda i: (0, 0)),
    ]
    in_specs += [pl.BlockSpec(w.shape, lambda i: (0, 0)) for w in ws]
    in_specs += [pl.BlockSpec((1, z_pad), lambda i: (0, 0)) for _ in biases]
    in_specs += [pl.BlockSpec((1, z_pad), lambda i: (0, 0))]

    flops = 2 * n_pad * f_pad * z_pad + nm_layers * 2 * n_pad * n_pad * z_pad
    bytes_accessed = (n_pad * n_pad * 2 + n_pad * f_pad * 2
                      + nm_layers * z_pad * z_pad * 2 + n_pad * z_pad * 4)

    return pl.pallas_call(
        kernel,
        out_shape=jax.ShapeDtypeStruct((n_pad, z_pad), jnp.float32),
        grid=(1,),
        in_specs=in_specs,
        out_specs=pl.BlockSpec((n_pad, z_pad), lambda i: (0, 0)),
        compiler_params=pltpu.CompilerParams(
            dimension_semantics=("arbitrary",),
            vmem_limit_bytes=_VMEM_LIMIT),
        cost_estimate=pl.CostEstimate(
            flops=flops, transcendentals=0, bytes_accessed=bytes_accessed),
    )(a_pad, x_pad, *ws, *biases, alpha)


# ----------------------------------------------------------------------------
# Large-graph path, kernel 1 (layer 0 only): XW = X @ W, bf16 in/out, f32 accum
# ----------------------------------------------------------------------------
def xw_matmul(x_bf16, w_bf16, *, tm, tf):
    n_pad, f_pad = x_bf16.shape
    z_pad = w_bf16.shape[1]

    def kernel(x_ref, w_ref, o_ref, acc_ref):
        k = pl.program_id(1)

        @pl.when(k == 0)
        def _():
            acc_ref[...] = jnp.zeros_like(acc_ref)

        acc_ref[...] += jnp.dot(x_ref[...], w_ref[...],
                                preferred_element_type=jnp.float32)

        @pl.when(k == pl.num_programs(1) - 1)
        def _():
            o_ref[...] = acc_ref[...].astype(o_ref.dtype)

    return pl.pallas_call(
        kernel,
        out_shape=jax.ShapeDtypeStruct((n_pad, z_pad), jnp.bfloat16),
        grid_spec=pltpu.PrefetchScalarGridSpec(
            num_scalar_prefetch=0,
            grid=(n_pad // tm, f_pad // tf),
            in_specs=[pl.BlockSpec((tm, tf), lambda i, k: (i, k)),
                      pl.BlockSpec((tf, z_pad), lambda i, k: (k, 0))],
            out_specs=pl.BlockSpec((tm, z_pad), lambda i, k: (i, 0)),
            scratch_shapes=[pltpu.VMEM((tm, z_pad), jnp.float32)]),
        compiler_params=pltpu.CompilerParams(
            dimension_semantics=("parallel", "arbitrary"),
            vmem_limit_bytes=_VMEM_LIMIT),
        cost_estimate=pl.CostEstimate(
            flops=2 * n_pad * f_pad * z_pad, transcendentals=0,
            bytes_accessed=n_pad * f_pad * 2 + f_pad * z_pad * 2
            + n_pad * z_pad * 2),
    )(x_bf16, w_bf16)


# ----------------------------------------------------------------------------
# Large-graph path, kernel 2 (per layer):
#   out = PReLU(A_hat @ XW + b)              (final layer, f32)
#   out = PReLU(A_hat @ XW + b) @ W_next     (intermediate layers, bf16 = next XW)
# ----------------------------------------------------------------------------
def agg_layer(a_pad, xw, bias, alpha, w_next, *, tm, tk, xw_resident):
    n_pad = a_pad.shape[0]
    z_pad = xw.shape[1]
    n_k = n_pad // tk
    fuse_next = w_next is not None
    out_dtype = jnp.bfloat16 if fuse_next else jnp.float32

    def kernel(a_ref, xw_ref, b_ref, alpha_ref, *rest):
        if fuse_next:
            wn_ref, o_ref, acc_ref = rest
        else:
            o_ref, acc_ref = rest
        k = pl.program_id(1)

        @pl.when(k == 0)
        def _():
            acc_ref[...] = jnp.zeros_like(acc_ref)

        if xw_resident:
            start = pl.multiple_of(k * tk, tk)
            xw_blk = xw_ref[pl.ds(start, tk), :]
        else:
            xw_blk = xw_ref[...]
        acc_ref[...] += jnp.dot(a_ref[...], xw_blk,
                                preferred_element_type=jnp.float32)

        @pl.when(k == n_k - 1)
        def _():
            h = acc_ref[...] + b_ref[...]
            h = jnp.where(h > 0.0, h, alpha_ref[...] * h)
            if fuse_next:
                o_ref[...] = jnp.dot(
                    h.astype(jnp.bfloat16), wn_ref[...],
                    preferred_element_type=jnp.float32).astype(o_ref.dtype)
            else:
                o_ref[...] = h.astype(o_ref.dtype)

    if xw_resident:
        xw_spec = pl.BlockSpec((n_pad, z_pad), lambda i, k: (0, 0))  # fetched once
    else:
        xw_spec = pl.BlockSpec((tk, z_pad), lambda i, k: (k, 0))

    in_specs = [
        pl.BlockSpec((tm, tk), lambda i, k: (i, k)),   # A tile
        xw_spec,                                       # XW (resident or streamed)
        pl.BlockSpec((1, z_pad), lambda i, k: (0, 0)),  # bias
        pl.BlockSpec((1, z_pad), lambda i, k: (0, 0)),  # PReLU slope
    ]
    args = [a_pad, xw, bias, alpha]
    if fuse_next:
        in_specs.append(pl.BlockSpec((z_pad, z_pad), lambda i, k: (0, 0)))
        args.append(w_next)

    flops = 2 * n_pad * n_pad * z_pad
    if fuse_next:
        flops += 2 * n_pad * z_pad * z_pad
    bytes_accessed = (n_pad * n_pad * 2 + n_pad * z_pad * 2
                      + n_pad * z_pad * (2 if fuse_next else 4) + 2 * z_pad * 4)

    return pl.pallas_call(
        kernel,
        out_shape=jax.ShapeDtypeStruct((n_pad, z_pad), out_dtype),
        grid_spec=pltpu.PrefetchScalarGridSpec(
            num_scalar_prefetch=0,
            grid=(n_pad // tm, n_k),
            in_specs=in_specs,
            out_specs=pl.BlockSpec((tm, z_pad), lambda i, k: (i, 0)),
            scratch_shapes=[pltpu.VMEM((tm, z_pad), jnp.float32)]),
        compiler_params=pltpu.CompilerParams(
            dimension_semantics=("parallel", "arbitrary"),
            vmem_limit_bytes=_VMEM_LIMIT),
        cost_estimate=pl.CostEstimate(
            flops=flops, transcendentals=0, bytes_accessed=bytes_accessed),
    )(*args)


# ----------------------------------------------------------------------------
# Encoder: parameters + forward
# ----------------------------------------------------------------------------
def init_encoder_params(key, config):
    in_dim = config["in_dim"]
    z_dim = config["z_dim"]
    nm_layers = config["nm_layers"]
    params = {"weights": [], "biases": []}
    for i in range(nm_layers):
        fan_in = in_dim if i == 0 else z_dim
        key, sub = jax.random.split(key)
        limit = jnp.sqrt(6.0 / (fan_in + z_dim))       # glorot-uniform (GCNConv default)
        w = jax.random.uniform(sub, (fan_in, z_dim), jnp.float32, -limit, limit)
        params["weights"].append(w)
        params["biases"].append(jnp.zeros((1, z_dim), dtype=jnp.float32))
    # shared per-channel PReLU slope, PyTorch default 0.25
    params["alpha"] = jnp.full((1, z_dim), 0.25, dtype=jnp.float32)
    return params


@functools.partial(jax.jit, static_argnames=("nm_layers", "num_nodes"))
def encoder_forward(params, x, edge_index, edge_weight, nm_layers, num_nodes):
    in_dim = x.shape[1]
    z_dim = params["alpha"].shape[1]
    z_pad = _round_up(z_dim, 128)
    f_pad = _round_up(in_dim, 128)

    alpha = _pad2(params["alpha"], 1, z_pad)
    biases = [_pad2(b, 1, z_pad) for b in params["biases"]]
    ws = [_pad2(params["weights"][0], f_pad, z_pad).astype(jnp.bfloat16)]
    ws += [_pad2(w, z_pad, z_pad).astype(jnp.bfloat16)
           for w in params["weights"][1:]]

    use_fused = (num_nodes <= _FUSED_MAX_N) and (f_pad <= _FUSED_MAX_F)

    if use_fused:
        n_pad = _round_up(num_nodes, 128)
        a_pad = build_norm_adj_bf16(edge_index, edge_weight, num_nodes, n_pad)
        x_pad = _pad2(x, n_pad, f_pad).astype(jnp.bfloat16)
        h = fused_encoder_call(a_pad, x_pad, ws, biases, alpha,
                               nm_layers=nm_layers, n_pad=n_pad,
                               f_pad=f_pad, z_pad=z_pad)
    else:
        n_pad, tm, tk = _pick_tiles(num_nodes)
        a_pad = build_norm_adj_bf16(edge_index, edge_weight, num_nodes, n_pad)
        x_pad = _pad2(x, n_pad, f_pad).astype(jnp.bfloat16)
        # keep XW fully VMEM-resident when (double-buffered) it fits the budget
        xw_resident = (2 * n_pad * z_pad * 2) <= _XW_RESIDENT_MAX_BYTES
        tf = 512 if f_pad % 512 == 0 else (256 if f_pad % 256 == 0 else 128)

        cur = xw_matmul(x_pad, ws[0], tm=tm, tf=tf)     # bf16 [n_pad, z_pad]
        for i in range(nm_layers):
            w_next = ws[i + 1] if i < nm_layers - 1 else None
            cur = agg_layer(a_pad, cur, biases[i], alpha, w_next,
                            tm=tm, tk=tk, xw_resident=xw_resident)
        h = cur                                          # f32 [n_pad, z_pad]

    return h[:num_nodes, :z_dim]


# ----------------------------------------------------------------------------
# Demo
# ----------------------------------------------------------------------------
if __name__ == "__main__":
    config = {"in_dim": 8, "z_dim": 32, "nm_layers": 2}
    N = 16          # nodes
    E = 40          # directed edges

    key = jax.random.PRNGKey(0)
    k_feat, k_src, k_dst, k_params = jax.random.split(key, 4)

    x = jax.random.normal(k_feat, (N, config["in_dim"]), dtype=jnp.float32)
    edge_index = jnp.stack([
        jax.random.randint(k_src, (E,), 0, N, dtype=jnp.int32),
        jax.random.randint(k_dst, (E,), 0, N, dtype=jnp.int32),
    ])
    edge_weight = None  # GCNConv treats missing weights as ones

    params = init_encoder_params(k_params, config)

    out = encoder_forward(params, x, edge_index, edge_weight,
                          nm_layers=config["nm_layers"], num_nodes=N)
    out = jax.block_until_ready(out)

    assert out.shape == (N, config["z_dim"])
    assert jnp.all(jnp.isfinite(out))
    print("KERNEL_OK")
</pallas_src>

<mosaic_0001>
module attributes {stable_mosaic.version = 11 : i64} {
  func.func private @main(%arg0: i32) attributes {dimension_semantics = [#tpu.dimension_semantics<core_parallel>], iteration_bounds = array<i64: 2>, tpu.core_type = #tpu.core_type<sc_scalar_subcore>, window_params = []} {
    return
  }
}

module attributes {stable_mosaic.version = 11 : i64} {
  func.func private @main(%arg0: i32) attributes {dimension_semantics = [#tpu.dimension_semantics<core_parallel>], iteration_bounds = array<i64: 2>, tpu.core_type = #tpu.core_type<sc_scalar_subcore>, window_params = []} {
    return
  }
}

module attributes {stable_mosaic.version = 11 : i64} {
  func.func @kernel(%arg0: i32, %arg1: memref<128x128xbf16, #tpu.memory_space<vmem>>, %arg2: memref<128x128xbf16, #tpu.memory_space<vmem>>, %arg3: memref<128x128xbf16, #tpu.memory_space<vmem>>, %arg4: memref<128x128xbf16, #tpu.memory_space<vmem>>, %arg5: memref<1x128xf32, #tpu.memory_space<vmem>>, %arg6: memref<1x128xf32, #tpu.memory_space<vmem>>, %arg7: memref<1x128xf32, #tpu.memory_space<vmem>>, %arg8: memref<128x128xf32, #tpu.memory_space<vmem>>) attributes {dimension_semantics = [#tpu.dimension_semantics<arbitrary>], iteration_bounds = array<i64: 1>, scalar_prefetch = 0 : i64, scratch_operands = 0 : i64, tpu.core_type = #tpu.core_type<tc>, window_params = [{pipeline_mode = #tpu.pipeline_mode<synchronous>, transform_indices = @transform_0, window_bounds = array<i64: 128, 128>}, {pipeline_mode = #tpu.pipeline_mode<synchronous>, transform_indices = @transform_1, window_bounds = array<i64: 128, 128>}, {pipeline_mode = #tpu.pipeline_mode<synchronous>, transform_indices = @transform_2, window_bounds = array<i64: 128, 128>}, {pipeline_mode = #tpu.pipeline_mode<synchronous>, transform_indices = @transform_3, window_bounds = array<i64: 128, 128>}, {pipeline_mode = #tpu.pipeline_mode<synchronous>, transform_indices = @transform_4, window_bounds = array<i64: 1, 128>}, {pipeline_mode = #tpu.pipeline_mode<synchronous>, transform_indices = @transform_5, window_bounds = array<i64: 1, 128>}, {pipeline_mode = #tpu.pipeline_mode<synchronous>, transform_indices = @transform_6, window_bounds = array<i64: 1, 128>}, {pipeline_mode = #tpu.pipeline_mode<synchronous>, transform_indices = @transform_7, window_bounds = array<i64: 128, 128>}]} {
    %c0 = arith.constant 0 : index
    %c0_0 = arith.constant 0 : index
    %0 = vector.load %arg1[%c0, %c0_0] : memref<128x128xbf16, #tpu.memory_space<vmem>>, vector<128x128xbf16>
    %c0_1 = arith.constant 0 : index
    %c0_2 = arith.constant 0 : index
    %1 = vector.load %arg7[%c0_1, %c0_2] : memref<1x128xf32, #tpu.memory_space<vmem>>, vector<1x128xf32>
    %c0_3 = arith.constant 0 : index
    %c0_4 = arith.constant 0 : index
    %2 = vector.load %arg2[%c0_3, %c0_4] : memref<128x128xbf16, #tpu.memory_space<vmem>>, vector<128x128xbf16>
    %c0_5 = arith.constant 0 : index
    %c0_6 = arith.constant 0 : index
    %3 = vector.load %arg3[%c0_5, %c0_6] : memref<128x128xbf16, #tpu.memory_space<vmem>>, vector<128x128xbf16>
    %cst = arith.constant dense<0.000000e+00> : vector<128x128xf32>
    %4 = tpu.matmul %2, %3, %cst {dimension_numbers = #tpu.dot_dimension_numbers<[1], [0], [0], [1], [0, 0, 1, 1], [], []>} : vector<128x128xbf16>, vector<128x128xbf16>, vector<128x128xf32> -> vector<128x128xf32>
    %5 = arith.truncf %4 : vector<128x128xf32> to vector<128x128xbf16>
    %cst_7 = arith.constant dense<0.000000e+00> : vector<128x128xf32>
    %6 = tpu.matmul %0, %5, %cst_7 {dimension_numbers = #tpu.dot_dimension_numbers<[1], [0], [0], [1], [0, 0, 1, 1], [], []>} : vector<128x128xbf16>, vector<128x128xbf16>, vector<128x128xf32> -> vector<128x128xf32>
    %c0_8 = arith.constant 0 : index
    %c0_9 = arith.constant 0 : index
    %7 = vector.load %arg5[%c0_8, %c0_9] : memref<1x128xf32, #tpu.memory_space<vmem>>, vector<1x128xf32>
    %8 = vector.broadcast %7 : vector<1x128xf32> to vector<128x128xf32>
    %9 = arith.addf %6, %8 : vector<128x128xf32>
    %cst_10 = arith.constant 0.000000e+00 : f32
    %10 = vector.broadcast %cst_10 : f32 to vector<128x128xf32>
    %11 = arith.cmpf ogt, %9, %10 : vector<128x128xf32>
    %12 = vector.broadcast %1 : vector<1x128xf32> to vector<128x128xf32>
    %13 = arith.mulf %12, %9 : vector<128x128xf32>
    %14 = arith.select %11, %9, %13 : vector<128x128xi1>, vector<128x128xf32>
    %15 = arith.truncf %14 : vector<128x128xf32> to vector<128x128xbf16>
    %c0_11 = arith.constant 0 : index
    %c0_12 = arith.constant 0 : index
    %16 = vector.load %arg4[%c0_11, %c0_12] : memref<128x128xbf16, #tpu.memory_space<vmem>>, vector<128x128xbf16>
    %cst_13 = arith.constant dense<0.000000e+00> : vector<128x128xf32>
    %17 = tpu.matmul %15, %16, %cst_13 {dimension_numbers = #tpu.dot_dimension_numbers<[1], [0], [0], [1], [0, 0, 1, 1], [], []>} : vector<128x128xbf16>, vector<128x128xbf16>, vector<128x128xf32> -> vector<128x128xf32>
    %18 = arith.truncf %17 : vector<128x128xf32> to vector<128x128xbf16>
    %cst_14 = arith.constant dense<0.000000e+00> : vector<128x128xf32>
    %19 = tpu.matmul %0, %18, %cst_14 {dimension_numbers = #tpu.dot_dimension_numbers<[1], [0], [0], [1], [0, 0, 1, 1], [], []>} : vector<128x128xbf16>, vector<128x128xbf16>, vector<128x128xf32> -> vector<128x128xf32>
    %c0_15 = arith.constant 0 : index
    %c0_16 = arith.constant 0 : index
    %20 = vector.load %arg6[%c0_15, %c0_16] : memref<1x128xf32, #tpu.memory_space<vmem>>, vector<1x128xf32>
    %21 = vector.broadcast %20 : vector<1x128xf32> to vector<128x128xf32>
    %22 = arith.addf %19, %21 : vector<128x128xf32>
    %cst_17 = arith.constant 0.000000e+00 : f32
    %23 = vector.broadcast %cst_17 : f32 to vector<128x128xf32>
    %24 = arith.cmpf ogt, %22, %23 : vector<128x128xf32>
    %25 = vector.broadcast %1 : vector<1x128xf32> to vector<128x128xf32>
    %26 = arith.mulf %25, %22 : vector<128x128xf32>
    %27 = arith.select %24, %22, %26 : vector<128x128xi1>, vector<128x128xf32>
    %c0_18 = arith.constant 0 : index
    %c0_19 = arith.constant 0 : index
    %28 = vector.load %arg8[%c0_18, %c0_19] : memref<128x128xf32, #tpu.memory_space<vmem>>, vector<128x128xf32>
    tpu.vector_store %arg8[%c0_18, %c0_19], %27 {strides = array<i32>} : memref<128x128xf32, #tpu.memory_space<vmem>>, vector<128x128xf32>,
    return
  }
  func.func @transform_0(%arg0: i32) -> (i32, i32) {
    %c0_i32 = arith.constant 0 : i32
    %c0_i32_0 = arith.constant 0 : i32
    %c0_i32_1 = arith.constant 0 : i32
    return %c0_i32, %c0_i32_0 : i32, i32
  }
  func.func @transform_1(%arg0: i32) -> (i32, i32) {
    %c0_i32 = arith.constant 0 : i32
    %c0_i32_0 = arith.constant 0 : i32
    %c0_i32_1 = arith.constant 0 : i32
    return %c0_i32, %c0_i32_0 : i32, i32
  }
  func.func @transform_2(%arg0: i32) -> (i32, i32) {
    %c0_i32 = arith.constant 0 : i32
    %c0_i32_0 = arith.constant 0 : i32
    %c0_i32_1 = arith.constant 0 : i32
    return %c0_i32, %c0_i32_0 : i32, i32
  }
  func.func @transform_3(%arg0: i32) -> (i32, i32) {
    %c0_i32 = arith.constant 0 : i32
    %c0_i32_0 = arith.constant 0 : i32
    %c0_i32_1 = arith.constant 0 : i32
    return %c0_i32, %c0_i32_0 : i32, i32
  }
  func.func @transform_4(%arg0: i32) -> (i32, i32) {
    %c0_i32 = arith.constant 0 : i32
    %c0_i32_0 = arith.constant 0 : i32
    %c0_i32_1 = arith.constant 0 : i32
    return %c0_i32, %c0_i32_0 : i32, i32
  }
  func.func @transform_5(%arg0: i32) -> (i32, i32) {
    %c0_i32 = arith.constant 0 : i32
    %c0_i32_0 = arith.constant 0 : i32
    %c0_i32_1 = arith.constant 0 : i32
    return %c0_i32, %c0_i32_0 : i32, i32
  }
  func.func @transform_6(%arg0: i32) -> (i32, i32) {
    %c0_i32 = arith.constant 0 : i32
    %c0_i32_0 = arith.constant 0 : i32
    %c0_i32_1 = arith.constant 0 : i32
    return %c0_i32, %c0_i32_0 : i32, i32
  }
  func.func @transform_7(%arg0: i32) -> (i32, i32) {
    %c0_i32 = arith.constant 0 : i32
    %c0_i32_0 = arith.constant 0 : i32
    %c0_i32_1 = arith.constant 0 : i32
    return %c0_i32, %c0_i32_0 : i32, i32
  }
}

</mosaic_0001>

<bundles_post_ra>
// kernel: encoder_forward.1
= control target key start
LH: loop header
LB: loop body
LE: loop exit
PB: predicated region body
PF: predicated region fallthrough
CT: control target
= control target key end

     0   :  { %s1386_s2 = inlined_call_operand.vmem [shape: bf16[128,128], index: 2, kind: input, shape index: {}]   ;;  %s1387_s1 = inlined_call_operand.vmem [shape: bf16[128,128], index: 1, kind: input, shape index: {}]   ;;  %s1388_s0 = inlined_call_operand.vmem [shape: bf16[128,128], index: 0, kind: input, shape index: {}]   ;;  %s1389_s3 = inlined_call_operand.vmem [shape: bf16[128,128], index: 3, kind: input, shape index: {}]   ;;  %s1390_s4 = inlined_call_operand.vmem [shape: f32[1,128], index: 4, kind: input, shape index: {}]   ;;  %s1391_s6 = inlined_call_operand.vmem [shape: f32[1,128], index: 6, kind: input, shape index: {}]   ;;  %s1392_s5 = inlined_call_operand.vmem [shape: f32[1,128], index: 5, kind: input, shape index: {}]   ;;  %s1393_s7 = inlined_call_operand.vmem [shape: f32[128,128], index: 7, kind: output, shape index: {}]  }
   0x1   :  { %v1059_v0 = vld [vmem:[%s1386_s2 + $0x38] sm:$0xff]   ;;  %v1060_v1 = vld [vmem:[%s1386_s2 + $0x30] sm:$0xff]   ;;  %v1061_v2 = vld [vmem:[%s1386_s2 + $0x28] sm:$0xff]  }
   0x2   :  { %931 = vmatprep.subr.bf16.mxu0 %v1059_v0  ;;  %v1062_v3 = vld [vmem:[%s1386_s2 + $0x20] sm:$0xff]   ;;  %v1063_v5 = vld [vmem:[%s1386_s2 + $0x18] sm:$0xff]   ;;  %v1064_v6 = vld [vmem:[%s1386_s2 + $0x10] sm:$0xff]  }
   0x3   :  { %932 = vmatpush3.bf16.msra.mxu0 %v1059_v0  ;;  %v1067_v4 = vld [vmem:[%s1387_s1] sm:$0xff]   ;;  %v1065_v7 = vld [vmem:[%s1386_s2 + $0x8] sm:$0xff]   ;;  %v1069_v10 = vld [vmem:[%s1387_s1 + $0x10] sm:$0xff]  }
   0x4   :  { %933 = vmatprep.subr.bf16.mxu0 %v1060_v1  ;;  %947 = vmatprep.mubr.bf16.mxu0 %v1067_v4  ;;  %v1066_v8 = vld [vmem:[%s1386_s2] sm:$0xff]   ;;  %v1068_v9 = vld [vmem:[%s1387_s1 + $0x8] sm:$0xff]   ;;  %v1070_v11 = vld [vmem:[%s1387_s1 + $0x18] sm:$0xff]  }
   0x5   :  { %v1071_v12 = vld [vmem:[%s1387_s1 + $0x20] sm:$0xff]   ;;  %v1072_v13 = vld [vmem:[%s1387_s1 + $0x28] sm:$0xff]   ;;  %v1073_v14 = vld [vmem:[%s1387_s1 + $0x30] sm:$0xff]  }
   0x6   :  { %v1074_v15 = vld [vmem:[%s1387_s1 + $0x38] sm:$0xff]   ;;  %v1182_v16 = vld [vmem:[%s1388_s0] sm:$0xff]   ;;  %v1084_v18 = vld [vmem:[%s1389_s3 + $0x30] sm:$0xff]  }
   0x7   :  { %934 = vmatpush3.bf16.msra.mxu0 %v1060_v1  ;;  %979 = vmatprep.mubr.bf16.mxu1 %v1182_v16  ;;  %v1083_v17 = vld [vmem:[%s1389_s3 + $0x38] sm:$0xff]   ;;  %v1085_v19 = vld [vmem:[%s1389_s3 + $0x28] sm:$0xff]   ;;  %v1086_v20 = vld [vmem:[%s1389_s3 + $0x20] sm:$0xff]  }
   0x8   :  { %935 = vmatprep.subr.bf16.mxu0 %v1061_v2  ;;  %v1087_v21 = vld [vmem:[%s1389_s3 + $0x18] sm:$0xff]   ;;  %v1203_v46 = vld [vmem:[%s1388_s0 + $0x8] sm:$0xff]   ;;  %v1208_v47 = vld [vmem:[%s1388_s0 + $0x10] sm:$0xff]  }
   0x9   :  { %v1215_v48 = vld [vmem:[%s1388_s0 + $0x18] sm:$0xff]   ;;  %v1220_v49 = vld [vmem:[%s1388_s0 + $0x20] sm:$0xff]   ;;  %v1227_v50 = vld [vmem:[%s1388_s0 + $0x28] sm:$0xff]  }
   0xa   :  { %v1232_v51 = vld [vmem:[%s1388_s0 + $0x30] sm:$0xff]   ;;  %v1239_v52 = vld [vmem:[%s1388_s0 + $0x38] sm:$0xff]   ;;  %v1089_v54 = vld [vmem:[%s1389_s3 + $0x8] sm:$0xff]  }
   0xb   :  { %936 = vmatpush3.bf16.msra.mxu0 %v1061_v2  ;;  %v1088_v53 = vld [vmem:[%s1389_s3 + $0x10] sm:$0xff]   ;;  %v1090_v55 = vld [vmem:[%s1389_s3] sm:$0xff]  }
   0xc   :  { %937 = vmatprep.subr.bf16.mxu0 %v1062_v3  ;;  %v1255_v57 = vld [vmem:[%s1390_s4] ss:$0 sm:$0xff] }
   0xd   :  { %v1262_v62 = vld [vmem:[%s1391_s6] ss:$0 sm:$0xff] }
   0xf   :  { %938 = vmatpush3.bf16.msra.mxu0 %v1062_v3 }
  0x10   :  { %939 = vmatprep.subr.bf16.mxu0 %v1063_v5 }
  0x13   :  { %940 = vmatpush3.bf16.msra.mxu0 %v1063_v5 }
  0x14   :  { %941 = vmatprep.subr.bf16.mxu0 %v1064_v6 }
  0x17   :  { %942 = vmatpush3.bf16.msra.mxu0 %v1064_v6 }
  0x18   :  { %943 = vmatprep.subr.bf16.mxu0 %v1065_v7 }
  0x1b   :  { %944 = vmatpush3.bf16.msra.mxu0 %v1065_v7 }
  0x1c   :  { %945 = vmatprep.subr.bf16.mxu0 %v1066_v8 }
  0x1f   :  { %946 = vmatpush3.bf16.msra.mxu0 %v1066_v8 }
  0x20   :  { %995 = vmatprep.subr.bf16.mxu0 %v1083_v17 }
  0x22   :  { %948 = vmatmul.mubr.bf16.vlgmr.msra.gmra.mxu0 %v1068_v9 }
  0x23   :  { %951 = vmatprep.mubr.bf16.mxu0 %v1069_v10  ;;  %996 = vmatpush3.bf16.msra.mxu0 %v1083_v17 }
  0x24   :  { %997 = vmatprep.subr.bf16.mxu0 %v1084_v18 }
  0x27   :  { %998 = vmatpush3.bf16.msra.mxu0 %v1084_v18 }
  0x28   :  { %999 = vmatprep.subr.bf16.mxu0 %v1085_v19 }
  0x2a   :  { %952 = vmatmul.mubr.bf16.gmra.mxu0 %v1070_v11 }
  0x2b   :  { %955 = vmatprep.mubr.bf16.mxu0 %v1071_v12  ;;  %1000 = vmatpush3.bf16.msra.mxu0 %v1085_v19 }
  0x2c   :  { %1001 = vmatprep.subr.bf16.mxu0 %v1086_v20 }
  0x2f   :  { %1002 = vmatpush3.bf16.msra.mxu0 %v1086_v20 }
  0x30   :  { %1003 = vmatprep.subr.bf16.mxu0 %v1087_v21 }
  0x32   :  { %956 = vmatmul.mubr.bf16.gmra.mxu0 %v1072_v13 }
  0x33   :  { %959 = vmatprep.mubr.bf16.mxu0 %v1073_v14  ;;  %1004 = vmatpush3.bf16.msra.mxu0 %v1087_v21 }
  0x34   :  { %1005 = vmatprep.subr.bf16.mxu0 %v1088_v53 }
  0x37   :  { %1006 = vmatpush3.bf16.msra.mxu0 %v1088_v53 }
  0x38   :  { %1007 = vmatprep.subr.bf16.mxu0 %v1089_v54 }
  0x3a   :  { %960 = vmatmul.mubr.bf16.gmra.mxu0 %v1074_v15 }
  0x3b   :  { %1008 = vmatpush3.bf16.msra.mxu0 %v1089_v54 }
  0x3c   :  { %1009 = vmatprep.subr.bf16.mxu0 %v1090_v55 }
  0x3f   :  { %1010 = vmatpush3.bf16.msra.mxu0 %v1090_v55 }
  0xe2   :  { %v949_v22 = vpop.f32.mrf.mxu0 }
  0xe4   :  { %v206_v23 = vpop.f32.mrf.mxu0 }
  0xe6   :  { %v950_v24 = vpop.f32.mrf.mxu0 }
  0xe7   :  { %v270_v44 = vpack.c.bf16 %v950_v24, %v949_v22 }
  0xe8   :  { %v209_v25 = vpop.f32.mrf.mxu0 }
  0xe9   :  { %v269_v45 = vpack.c.bf16 %v209_v25, %v206_v23 }
  0xea   :  { %v953_v26 = vpop.f32.mrf.mxu0 }
  0xec   :  { %v222_v27 = vpop.f32.mrf.mxu0 }
  0xee   :  { %v954_v28 = vpop.f32.mrf.mxu0 }
  0xef   :  { %v272_v42 = vpack.c.bf16 %v954_v28, %v953_v26 }
  0xf0   :  { %v225_v29 = vpop.f32.mrf.mxu0 }
  0xf1   :  { %v271_v43 = vpack.c.bf16 %v225_v29, %v222_v27 }
  0xf2   :  { %v957_v30 = vpop.f32.mrf.mxu0 }
  0xf4   :  { %v238_v31 = vpop.f32.mrf.mxu0 }
  0xf6   :  { %v958_v32 = vpop.f32.mrf.mxu0 }
  0xf7   :  { %v274_v40 = vpack.c.bf16 %v958_v32, %v957_v30 }
  0xf8   :  { %v241_v33 = vpop.f32.mrf.mxu0 }
  0xf9   :  { %v273_v41 = vpack.c.bf16 %v241_v33, %v238_v31 }
  0xfa   :  { %v961_v34 = vpop.f32.mrf.mxu0 }
  0xfc   :  { %v254_v35 = vpop.f32.mrf.mxu0 }
  0xfe   :  { %v962_v36 = vpop.f32.mrf.mxu0 }
  0xff   :  { %v276_v37 = vpack.c.bf16 %v962_v36, %v961_v34 }
 0x100   :  { %v257_v38 = vpop.f32.mrf.mxu0 }
 0x101   :  { %v275_v39 = vpack.c.bf16 %v257_v38, %v254_v35  ;;  %963 = vmatprep.subr.bf16.mxu1 %v276_v37 }
 0x102   :  { %964 = vmatpush3.bf16.msra.mxu1 %v276_v37 }
 0x103   :  { %965 = vmatprep.subr.bf16.mxu1 %v275_v39 }
 0x106   :  { %966 = vmatpush3.bf16.msra.mxu1 %v275_v39 }
 0x107   :  { %967 = vmatprep.subr.bf16.mxu1 %v274_v40 }
 0x10a   :  { %968 = vmatpush3.bf16.msra.mxu1 %v274_v40 }
 0x10b   :  { %969 = vmatprep.subr.bf16.mxu1 %v273_v41 }
 0x10e   :  { %970 = vmatpush3.bf16.msra.mxu1 %v273_v41 }
 0x10f   :  { %971 = vmatprep.subr.bf16.mxu1 %v272_v42 }
 0x112   :  { %972 = vmatpush3.bf16.msra.mxu1 %v272_v42 }
 0x113   :  { %973 = vmatprep.subr.bf16.mxu1 %v271_v43 }
 0x116   :  { %974 = vmatpush3.bf16.msra.mxu1 %v271_v43 }
 0x117   :  { %975 = vmatprep.subr.bf16.mxu1 %v270_v44 }
 0x11a   :  { %976 = vmatpush3.bf16.msra.mxu1 %v270_v44 }
 0x11b   :  { %977 = vmatprep.subr.bf16.mxu1 %v269_v45 }
 0x11e   :  { %978 = vmatpush3.bf16.msra.mxu1 %v269_v45 }
 0x121   :  { %980 = vmatmul.mubr.bf16.vlgmr.msra.gmra.mxu1 %v1203_v46 }
 0x122   :  { %983 = vmatprep.mubr.bf16.mxu1 %v1208_v47 }
 0x129   :  { %984 = vmatmul.mubr.bf16.gmra.mxu1 %v1215_v48 }
 0x12a   :  { %987 = vmatprep.mubr.bf16.mxu1 %v1220_v49 }
 0x131   :  { %988 = vmatmul.mubr.bf16.gmra.mxu1 %v1227_v50 }
 0x132   :  { %991 = vmatprep.mubr.bf16.mxu1 %v1232_v51 }
 0x139   :  { %992 = vmatmul.mubr.bf16.gmra.mxu1 %v1239_v52 }
 0x13a   :  { %1043 = vmatprep.mubr.bf16.mxu1 %v1182_v16 }
 0x1e1   :  { %v981_v56 = vpop.f32.mrf.mxu1 }
 0x1e2   :  { %v375_v60 = vadd.f32 %v981_v56, %v1255_v57 }
 0x1e3   :  { %v366_v58 = vpop.f32.mrf.mxu1 }
 0x1e4   :  { %v367_v59 = vadd.f32 %v1255_v57, %v366_v58  ;;  %v453_v4 = vmul.f32 %v1262_v62, %v375_v60  ;;  %vm431_vm2 = vcmp.gt.f32.partialorder %v375_v60, 0.0 }
 0x1e5   :  { %v982_v61 = vpop.f32.mrf.mxu1 }
 0x1e6   :  { %v378_v63 = vadd.f32 %v982_v61, %v1255_v57  ;;  %v451_v1 = vmul.f32 %v1262_v62, %v367_v59  ;;  %vm429_vm1 = vcmp.gt.f32.partialorder %v367_v59, 0.0  ;;  %v469_v12 = vsel %vm431_vm2, %v375_v60, %v453_v4 }
 0x1e7   :  { %v369_v0 = vpop.f32.mrf.mxu1 }
 0x1e8   :  { %vm432_vm0 = vcmp.gt.f32.partialorder %v378_v63, 0.0  ;;  %v454_v2 = vmul.f32 %v1262_v62, %v378_v63  ;;  %v370_v3 = vadd.f32 %v1255_v57, %v369_v0  ;;  %v467_v10 = vsel %vm429_vm1, %v367_v59, %v451_v1 }
 0x1e9   :  { %v985_v5 = vpop.f32.mrf.mxu1 }
 0x1ea   :  { %vm430_vm3 = vcmp.gt.f32.partialorder %v370_v3, 0.0  ;;  %v452_v6 = vmul.f32 %v1262_v62, %v370_v3  ;;  %v470_v7 = vsel %vm432_vm0, %v378_v63, %v454_v2  ;;  %v391_v13 = vadd.f32 %v985_v5, %v1255_v57 }
 0x1eb   :  { %v382_v8 = vpop.f32.mrf.mxu1  ;;  %v484_v16 = vpack.c.bf16 %v470_v7, %v469_v12 }
 0x1ec   :  { %v383_v9 = vadd.f32 %v1255_v57, %v382_v8  ;;  %v468_v11 = vsel %vm430_vm3, %v370_v3, %v452_v6  ;;  %v457_v22 = vmul.f32 %v1262_v62, %v391_v13  ;;  %vm435_vm6 = vcmp.gt.f32.partialorder %v391_v13, 0.0 }
 0x1ed   :  { %v986_v14 = vpop.f32.mrf.mxu1  ;;  %v483_v15 = vpack.c.bf16 %v468_v11, %v467_v10 }
 0x1ee   :  { %v394_v17 = vadd.f32 %v986_v14, %v1255_v57  ;;  %v455_v19 = vmul.f32 %v1262_v62, %v383_v9  ;;  %vm433_vm5 = vcmp.gt.f32.partialorder %v383_v9, 0.0  ;;  %v473_v33 = vsel %vm435_vm6, %v391_v13, %v457_v22 }
 0x1ef   :  { %v385_v18 = vpop.f32.mrf.mxu1  ;;  %1011 = vmatprep.mubr.bf16.mxu0 %v483_v15 }
 0x1f0   :  { %vm436_vm4 = vcmp.gt.f32.partialorder %v394_v17, 0.0  ;;  %v458_v20 = vmul.f32 %v1262_v62, %v394_v17  ;;  %v386_v21 = vadd.f32 %v1255_v57, %v385_v18  ;;  %1012 = vmatmul.mubr.bf16.vlgmr.msra.gmra.mxu0 %v484_v16  ;;  %v471_v28 = vsel %vm433_vm5, %v383_v9, %v455_v19 }
 0x1f1   :  { %v989_v23 = vpop.f32.mrf.mxu1 }
 0x1f2   :  { %vm434_vm7 = vcmp.gt.f32.partialorder %v386_v21, 0.0  ;;  %v456_v24 = vmul.f32 %v1262_v62, %v386_v21  ;;  %v474_v26 = vsel %vm436_vm4, %v394_v17, %v458_v20  ;;  %v407_v30 = vadd.f32 %v989_v23, %v1255_v57 }
 0x1f3   :  { %v398_v25 = vpop.f32.mrf.mxu1  ;;  %v486_v35 = vpack.c.bf16 %v474_v26, %v473_v33 }
 0x1f4   :  { %v399_v27 = vadd.f32 %v1255_v57, %v398_v25  ;;  %v472_v29 = vsel %vm434_vm7, %v386_v21, %v456_v24  ;;  %v461_v40 = vmul.f32 %v1262_v62, %v407_v30  ;;  %vm439_vm10 = vcmp.gt.f32.partialorder %v407_v30, 0.0 }
 0x1f5   :  { %v990_v31 = vpop.f32.mrf.mxu1  ;;  %v485_v32 = vpack.c.bf16 %v472_v29, %v471_v28 }
 0x1f6   :  { %v410_v34 = vadd.f32 %v990_v31, %v1255_v57  ;;  %v459_v37 = vmul.f32 %v1262_v62, %v399_v27  ;;  %vm437_vm9 = vcmp.gt.f32.partialorder %v399_v27, 0.0  ;;  %v477_v59 = vsel %vm439_vm10, %v407_v30, %v461_v40 }
 0x1f7   :  { %v401_v36 = vpop.f32.mrf.mxu1  ;;  %1015 = vmatprep.mubr.bf16.mxu0 %v485_v32 }
 0x1f8   :  { %vm440_vm8 = vcmp.gt.f32.partialorder %v410_v34, 0.0  ;;  %v462_v38 = vmul.f32 %v1262_v62, %v410_v34  ;;  %v402_v39 = vadd.f32 %v1255_v57, %v401_v36  ;;  %1016 = vmatmul.mubr.bf16.gmra.mxu0 %v486_v35  ;;  %v475_v53 = vsel %vm437_vm9, %v399_v27, %v459_v37 }
 0x1f9   :  { %v993_v41 = vpop.f32.mrf.mxu1 }
 0x1fa   :  { %vm438_vm11 = vcmp.gt.f32.partialorder %v402_v39, 0.0  ;;  %v460_v42 = vmul.f32 %v1262_v62, %v402_v39  ;;  %v478_v44 = vsel %vm440_vm8, %v410_v34, %v462_v38  ;;  %v423_v55 = vadd.f32 %v993_v41, %v1255_v57  ;;  %v1304_v34 = vld [vmem:[%s1392_s5] ss:$0 sm:$0xff] }
 0x1fb   :  { %v414_v43 = vpop.f32.mrf.mxu1  ;;  %v488_v61 = vpack.c.bf16 %v478_v44, %v477_v59 }
 0x1fc   :  { %v415_v45 = vadd.f32 %v1255_v57, %v414_v43  ;;  %v476_v54 = vsel %vm438_vm11, %v402_v39, %v460_v42  ;;  %v465_v3 = vmul.f32 %v1262_v62, %v423_v55  ;;  %vm443_vm14 = vcmp.gt.f32.partialorder %v423_v55, 0.0 }
 0x1fd   :  { %v994_v56 = vpop.f32.mrf.mxu1  ;;  %v487_v58 = vpack.c.bf16 %v476_v54, %v475_v53 }
 0x1fe   :  { %v426_v60 = vadd.f32 %v994_v56, %v1255_v57  ;;  %v463_v0 = vmul.f32 %v1262_v62, %v415_v45  ;;  %vm441_vm13 = vcmp.gt.f32.partialorder %v415_v45, 0.0  ;;  %v481_v9 = vsel %vm443_vm14, %v423_v55, %v465_v3 }
 0x1ff   :  { %v417_v63 = vpop.f32.mrf.mxu1  ;;  %1019 = vmatprep.mubr.bf16.mxu0 %v487_v58 }
 0x200   :  { %vm444_vm12 = vcmp.gt.f32.partialorder %v426_v60, 0.0  ;;  %v466_v1 = vmul.f32 %v1262_v62, %v426_v60  ;;  %v418_v2 = vadd.f32 %v1255_v57, %v417_v63  ;;  %1020 = vmatmul.mubr.bf16.gmra.mxu0 %v488_v61  ;;  %v479_v6 = vsel %vm441_vm13, %v415_v45, %v463_v0 }
 0x202   :  { %vm442_vm15 = vcmp.gt.f32.partialorder %v418_v2, 0.0  ;;  %v464_v4 = vmul.f32 %v1262_v62, %v418_v2  ;;  %v482_v5 = vsel %vm444_vm12, %v426_v60, %v466_v1 }
 0x203   :  { %v490_v10 = vpack.c.bf16 %v482_v5, %v481_v9 }
 0x204   :  { %v480_v7 = vsel %vm442_vm15, %v418_v2, %v464_v4 }
 0x205   :  { %v489_v8 = vpack.c.bf16 %v480_v7, %v479_v6 }
 0x207   :  { %1023 = vmatprep.mubr.bf16.mxu0 %v489_v8 }
 0x208   :  { %1024 = vmatmul.mubr.bf16.gmra.mxu0 %v490_v10 }
 0x2b0   :  { %v1013_v11 = vpop.f32.mrf.mxu0 }
 0x2b2   :  { %v589_v12 = vpop.f32.mrf.mxu0 }
 0x2b4   :  { %v1014_v13 = vpop.f32.mrf.mxu0 }
 0x2b5   :  { %v653_v32 = vpack.c.bf16 %v1014_v13, %v1013_v11 }
 0x2b6   :  { %v592_v57 = vpop.f32.mrf.mxu0 }
 0x2b7   :  { %v652_v33 = vpack.c.bf16 %v592_v57, %v589_v12 }
 0x2b8   :  { %v1017_v14 = vpop.f32.mrf.mxu0 }
 0x2ba   :  { %v605_v15 = vpop.f32.mrf.mxu0 }
 0x2bc   :  { %v1018_v16 = vpop.f32.mrf.mxu0 }
 0x2bd   :  { %v655_v30 = vpack.c.bf16 %v1018_v16, %v1017_v14 }
 0x2be   :  { %v608_v17 = vpop.f32.mrf.mxu0 }
 0x2bf   :  { %v654_v31 = vpack.c.bf16 %v608_v17, %v605_v15 }
 0x2c0   :  { %v1021_v18 = vpop.f32.mrf.mxu0 }
 0x2c2   :  { %v621_v19 = vpop.f32.mrf.mxu0 }
 0x2c4   :  { %v1022_v20 = vpop.f32.mrf.mxu0 }
 0x2c5   :  { %v657_v28 = vpack.c.bf16 %v1022_v20, %v1021_v18 }
 0x2c6   :  { %v624_v21 = vpop.f32.mrf.mxu0 }
 0x2c7   :  { %v656_v29 = vpack.c.bf16 %v624_v21, %v621_v19 }
 0x2c8   :  { %v1025_v22 = vpop.f32.mrf.mxu0 }
 0x2ca   :  { %v637_v23 = vpop.f32.mrf.mxu0 }
 0x2cc   :  { %v1026_v24 = vpop.f32.mrf.mxu0 }
 0x2cd   :  { %v659_v25 = vpack.c.bf16 %v1026_v24, %v1025_v22 }
 0x2ce   :  { %v640_v26 = vpop.f32.mrf.mxu0 }
 0x2cf   :  { %v658_v27 = vpack.c.bf16 %v640_v26, %v637_v23  ;;  %1027 = vmatprep.subr.bf16.mxu1 %v659_v25 }
 0x2d0   :  { %1028 = vmatpush3.bf16.msra.mxu1 %v659_v25 }
 0x2d1   :  { %1029 = vmatprep.subr.bf16.mxu1 %v658_v27 }
 0x2d4   :  { %1030 = vmatpush3.bf16.msra.mxu1 %v658_v27 }
 0x2d5   :  { %1031 = vmatprep.subr.bf16.mxu1 %v657_v28 }
 0x2d8   :  { %1032 = vmatpush3.bf16.msra.mxu1 %v657_v28 }
 0x2d9   :  { %1033 = vmatprep.subr.bf16.mxu1 %v656_v29 }
 0x2dc   :  { %1034 = vmatpush3.bf16.msra.mxu1 %v656_v29 }
 0x2dd   :  { %1035 = vmatprep.subr.bf16.mxu1 %v655_v30 }
 0x2e0   :  { %1036 = vmatpush3.bf16.msra.mxu1 %v655_v30 }
 0x2e1   :  { %1037 = vmatprep.subr.bf16.mxu1 %v654_v31 }
 0x2e4   :  { %1038 = vmatpush3.bf16.msra.mxu1 %v654_v31 }
 0x2e5   :  { %1039 = vmatprep.subr.bf16.mxu1 %v653_v32 }
 0x2e8   :  { %1040 = vmatpush3.bf16.msra.mxu1 %v653_v32 }
 0x2e9   :  { %1041 = vmatprep.subr.bf16.mxu1 %v652_v33 }
 0x2ec   :  { %1042 = vmatpush3.bf16.msra.mxu1 %v652_v33 }
 0x2ef   :  { %1044 = vmatmul.mubr.bf16.vlgmr.msra.gmra.mxu1 %v1203_v46 }
 0x2f0   :  { %1047 = vmatprep.mubr.bf16.mxu1 %v1208_v47 }
 0x2f7   :  { %1048 = vmatmul.mubr.bf16.gmra.mxu1 %v1215_v48 }
 0x2f8   :  { %1051 = vmatprep.mubr.bf16.mxu1 %v1220_v49 }
 0x2ff   :  { %1052 = vmatmul.mubr.bf16.gmra.mxu1 %v1227_v50 }
 0x300   :  { %1055 = vmatprep.mubr.bf16.mxu1 %v1232_v51 }
 0x307   :  { %1056 = vmatmul.mubr.bf16.gmra.mxu1 %v1239_v52 }
 0x3af   :  { %v1045_v35 = vpop.f32.mrf.mxu1 }
 0x3b0   :  { %v710_v46 = vadd.f32 %v1045_v35, %v1304_v34 }
 0x3b1   :  { %v701_v36 = vpop.f32.mrf.mxu1 }
 0x3b2   :  { %vm766_vm0 = vcmp.gt.f32.partialorder %v710_v46, 0.0  ;;  %v782_v47 = vmul.f32 %v1262_v62, %v710_v46  ;;  %v702_v48 = vadd.f32 %v1304_v34, %v701_v36 }
 0x3b3   :  { %v1046_v49 = vpop.f32.mrf.mxu1 }
 0x3b4   :  { %v798_v50 = vsel %vm766_vm0, %v710_v46, %v782_v47  ;;  %vm764_vm1 = vcmp.gt.f32.partialorder %v702_v48, 0.0  ;;  %v780_v51 = vmul.f32 %v1262_v62, %v702_v48  ;;  %v713_v52 = vadd.f32 %v1046_v49, %v1304_v34 }
 0x3b5   :  { %814 = vst [vmem:[%s1393_s7 + $0x10] sm:$0xff] %v798_v50  ;;  %v704_v37 = vpop.f32.mrf.mxu1 }
 0x3b6   :  { %v796_v38 = vsel %vm764_vm1, %v702_v48, %v780_v51  ;;  %vm767_vm2 = vcmp.gt.f32.partialorder %v713_v52, 0.0  ;;  %v783_v39 = vmul.f32 %v1262_v62, %v713_v52  ;;  %v705_v40 = vadd.f32 %v1304_v34, %v704_v37 }
 0x3b7   :  { %812 = vst [vmem:[%s1393_s7] sm:$0xff] %v796_v38  ;;  %v1049_v41 = vpop.f32.mrf.mxu1 }
 0x3b8   :  { %v799_v42 = vsel %vm767_vm2, %v713_v52, %v783_v39  ;;  %vm765_vm3 = vcmp.gt.f32.partialorder %v705_v40, 0.0  ;;  %v781_v43 = vmul.f32 %v1262_v62, %v705_v40  ;;  %v726_v44 = vadd.f32 %v1049_v41, %v1304_v34 }
 0x3b9   :  { %815 = vst [vmem:[%s1393_s7 + $0x18] sm:$0xff] %v799_v42  ;;  %v717_v45 = vpop.f32.mrf.mxu1 }
 0x3ba   :  { %v797_v53 = vsel %vm765_vm3, %v705_v40, %v781_v43  ;;  %vm770_vm4 = vcmp.gt.f32.partialorder %v726_v44, 0.0  ;;  %v786_v54 = vmul.f32 %v1262_v62, %v726_v44  ;;  %v718_v55 = vadd.f32 %v1304_v34, %v717_v45 }
 0x3bb   :  { %813 = vst [vmem:[%s1393_s7 + $0x8] sm:$0xff] %v797_v53  ;;  %v1050_v56 = vpop.f32.mrf.mxu1 }
 0x3bc   :  { %v802_v58 = vsel %vm770_vm4, %v726_v44, %v786_v54  ;;  %vm768_vm5 = vcmp.gt.f32.partialorder %v718_v55, 0.0  ;;  %v784_v59 = vmul.f32 %v1262_v62, %v718_v55  ;;  %v729_v60 = vadd.f32 %v1050_v56, %v1304_v34 }
 0x3bd   :  { %818 = vst [vmem:[%s1393_s7 + $0x30] sm:$0xff] %v802_v58  ;;  %v720_v61 = vpop.f32.mrf.mxu1 }
 0x3be   :  { %v800_v63 = vsel %vm768_vm5, %v718_v55, %v784_v59  ;;  %vm771_vm6 = vcmp.gt.f32.partialorder %v729_v60, 0.0  ;;  %v787_v0 = vmul.f32 %v1262_v62, %v729_v60  ;;  %v721_v1 = vadd.f32 %v1304_v34, %v720_v61 }
 0x3bf   :  { %816 = vst [vmem:[%s1393_s7 + $0x20] sm:$0xff] %v800_v63  ;;  %v1053_v2 = vpop.f32.mrf.mxu1 }
 0x3c0   :  { %v803_v3 = vsel %vm771_vm6, %v729_v60, %v787_v0  ;;  %vm769_vm7 = vcmp.gt.f32.partialorder %v721_v1, 0.0  ;;  %v785_v4 = vmul.f32 %v1262_v62, %v721_v1  ;;  %v742_v5 = vadd.f32 %v1053_v2, %v1304_v34 }
 0x3c1   :  { %819 = vst [vmem:[%s1393_s7 + $0x38] sm:$0xff] %v803_v3  ;;  %v733_v6 = vpop.f32.mrf.mxu1 }
 0x3c2   :  { %v801_v7 = vsel %vm769_vm7, %v721_v1, %v785_v4  ;;  %vm774_vm8 = vcmp.gt.f32.partialorder %v742_v5, 0.0  ;;  %v790_v8 = vmul.f32 %v1262_v62, %v742_v5  ;;  %v734_v9 = vadd.f32 %v1304_v34, %v733_v6 }
 0x3c3   :  { %817 = vst [vmem:[%s1393_s7 + $0x28] sm:$0xff] %v801_v7  ;;  %v1054_v10 = vpop.f32.mrf.mxu1 }
 0x3c4   :  { %v806_v11 = vsel %vm774_vm8, %v742_v5, %v790_v8  ;;  %vm772_vm9 = vcmp.gt.f32.partialorder %v734_v9, 0.0  ;;  %v788_v12 = vmul.f32 %v1262_v62, %v734_v9  ;;  %v745_v13 = vadd.f32 %v1054_v10, %v1304_v34 }
 0x3c5   :  { %822 = vst [vmem:[%s1393_s7 + $0x50] sm:$0xff] %v806_v11  ;;  %v736_v57 = vpop.f32.mrf.mxu1 }
 0x3c6   :  { %v804_v14 = vsel %vm772_vm9, %v734_v9, %v788_v12  ;;  %vm775_vm10 = vcmp.gt.f32.partialorder %v745_v13, 0.0  ;;  %v791_v15 = vmul.f32 %v1262_v62, %v745_v13  ;;  %v737_v16 = vadd.f32 %v1304_v34, %v736_v57 }
 0x3c7   :  { %820 = vst [vmem:[%s1393_s7 + $0x40] sm:$0xff] %v804_v14  ;;  %v1057_v17 = vpop.f32.mrf.mxu1 }
 0x3c8   :  { %v807_v18 = vsel %vm775_vm10, %v745_v13, %v791_v15  ;;  %vm773_vm11 = vcmp.gt.f32.partialorder %v737_v16, 0.0  ;;  %v789_v19 = vmul.f32 %v1262_v62, %v737_v16  ;;  %v758_v20 = vadd.f32 %v1057_v17, %v1304_v34 }
 0x3c9   :  { %823 = vst [vmem:[%s1393_s7 + $0x58] sm:$0xff] %v807_v18  ;;  %v749_v21 = vpop.f32.mrf.mxu1 }
 0x3ca   :  { %v805_v22 = vsel %vm773_vm11, %v737_v16, %v789_v19  ;;  %vm778_vm12 = vcmp.gt.f32.partialorder %v758_v20, 0.0  ;;  %v794_v23 = vmul.f32 %v1262_v62, %v758_v20  ;;  %v750_v24 = vadd.f32 %v1304_v34, %v749_v21 }
 0x3cb   :  { %821 = vst [vmem:[%s1393_s7 + $0x48] sm:$0xff] %v805_v22  ;;  %v1058_v25 = vpop.f32.mrf.mxu1 }
 0x3cc   :  { %v810_v26 = vsel %vm778_vm12, %v758_v20, %v794_v23  ;;  %vm776_vm13 = vcmp.gt.f32.partialorder %v750_v24, 0.0  ;;  %v792_v27 = vmul.f32 %v1262_v62, %v750_v24  ;;  %v761_v28 = vadd.f32 %v1058_v25, %v1304_v34 }
 0x3cd   :  { %826 = vst [vmem:[%s1393_s7 + $0x70] sm:$0xff] %v810_v26  ;;  %v752_v29 = vpop.f32.mrf.mxu1 }
 0x3ce   :  { %v808_v30 = vsel %vm776_vm13, %v750_v24, %v792_v27  ;;  %vm779_vm14 = vcmp.gt.f32.partialorder %v761_v28, 0.0  ;;  %v795_v31 = vmul.f32 %v1262_v62, %v761_v28  ;;  %v753_v32 = vadd.f32 %v1304_v34, %v752_v29 }
 0x3cf   :  { %824 = vst [vmem:[%s1393_s7 + $0x60] sm:$0xff] %v808_v30 }
 0x3d0   :  { %v811_v33 = vsel %vm779_vm14, %v761_v28, %v795_v31  ;;  %vm777_vm15 = vcmp.gt.f32.partialorder %v753_v32, 0.0  ;;  %v793_v35 = vmul.f32 %v1262_v62, %v753_v32 }
 0x3d1   :  { %827 = vst [vmem:[%s1393_s7 + $0x78] sm:$0xff] %v811_v33 }
 0x3d2   :  { %v809_v46 = vsel %vm777_vm15, %v753_v32, %v793_v35 }
 0x3d3   :  { %825 = vst [vmem:[%s1393_s7 + $0x68] sm:$0xff] %v809_v46 }

</bundles_post_ra>
